<compile_context>
chip_gen: v6e
topology: v6e:2x2x1
jax: 0.10.0
libtpu: 0.0.40
codegen_flags: <defaults>
</compile_context>

<pallas_src>
from typing import NamedTuple

import jax
import jax.numpy as jnp
import numpy as np
from jax.experimental import pallas as pl
from jax.experimental.pallas import tpu as pltpu

NUM_NEURONS = 5          # module default
IN_FEATURES = 784
HIDDEN = 20
NUM_CLASSES = 10
OUT_PAD = 128            # lane-dense output width (unmasked vst)
NEG_INF = -1e30          # bias for padded logit columns -> exp() == 0 in softmax (f32 path)
DEFAULT_TB = 2048        # batch-tile cap (amortizes ~0.35us/step; fits VMEM with the limit below)
MIN_TB = 512             # below this, per-step overhead dominates (measured 512-2048 ~ roofline)


class FCNetParams(NamedTuple):
    w1: jax.Array        # (784, 20)  f32
    w1_bf16: jax.Array   # (784, 20)  bf16 copy for the bf16-input path
    b1: jax.Array        # (1, 20)    f32
    w2: jax.Array        # (20, n)    f32
    b2: jax.Array        # (1, n)     f32
    w3p: jax.Array       # (n, 128)   f32, cols >= 10 are zero
    b3p: jax.Array       # (1, 128)   f32, cols >= 10 are -1e30


def fcnet_kernel(x_ref, w1_ref, b1_ref, w2_ref, b2_ref, w3_ref, b3_ref, o_ref):
    # dense_1 + ReLU.  x/W1 may be bf16; MXU accumulates in f32.
    h1 = jnp.dot(x_ref[...], w1_ref[...], preferred_element_type=jnp.float32) + b1_ref[...]
    h1 = jnp.maximum(h1, 0.0)

    # dense_2 + ReLU (tiny K=20/N=5 matmul; negligible cost, intentionally unpadded).
    h2 = jnp.dot(h1, w2_ref[...], preferred_element_type=jnp.float32) + b2_ref[...]
    h2 = jnp.maximum(h2, 0.0)

    # dense_out, padded to 128 lanes.  Padded columns: weight 0, bias -1e30.
    logits = jnp.dot(h2, w3_ref[...], preferred_element_type=jnp.float32) + b3_ref[...]

    # softmax(dim=1) over the lane axis (kept in f32; padded cols -> exp(-1e30) == 0).
    m = jnp.max(logits, axis=1, keepdims=True)
    e = jnp.exp(logits - m)
    inv = pl.reciprocal(jnp.sum(e, axis=1, keepdims=True), approx=True)  # EUP slot, ~1e-4 err
    o_ref[...] = (e * inv).astype(o_ref.dtype)


def _round_up(x, m):
    return ((x + m - 1) // m) * m


def _choose_tile_b(B, tile_b):
    """Batch tile: big enough to amortize per-step overhead, small enough to fit VMEM and
    to leave >=4 grid steps on large batches (v7x: 2 TCs x >=2 blocks for pipelining)."""
    if B <= tile_b and B <= MIN_TB:
        return B                                     # single full-array block (always legal)
    tb = min(tile_b, _round_up(B, 8))
    if B >= 2 * MIN_TB:                              # enough rows to split usefully
        tb = min(tb, max(MIN_TB, _round_up(pl.cdiv(B, 4), 8)))
    tb = max(8, (tb // 8) * 8)                       # f32/bf16 sublane multiple
    return B if tb >= B else tb


def _vmem_limit_bytes(tb, x_itemsize, out_itemsize):
    """Explicit scoped-VMEM request: double-buffered x + out tiles, plus headroom for the
    resident weights and f32 intermediates.  Floor 32 MiB (v5e default is only 16 MiB),
    cap 48 MiB (stay well inside v7x's 64 MiB physical)."""
    x_buf = 2 * tb * IN_FEATURES * x_itemsize
    out_buf = 2 * tb * OUT_PAD * out_itemsize
    return int(min(max(x_buf + out_buf + (16 << 20), 32 << 20), 48 << 20))


def prepare_params(params):
    """One-time weight packing (hoisted out of fcnet_forward):
    dense_out padded to 128 output lanes (zero weights, -1e30 bias) so the final store is
    unmasked/lane-dense, plus a bf16 copy of W1 for the bf16-input path."""
    w1, b1, w2, b2, w3, b3 = params
    w1 = w1.astype(jnp.float32)
    w3p = jnp.zeros((w3.shape[0], OUT_PAD), jnp.float32).at[:, :NUM_CLASSES].set(
        w3.astype(jnp.float32))
    b3p = jnp.full((1, OUT_PAD), NEG_INF, jnp.float32).at[:, :NUM_CLASSES].set(
        b3.reshape(1, -1).astype(jnp.float32))
    return FCNetParams(
        w1=w1,
        w1_bf16=w1.astype(jnp.bfloat16),
        b1=b1.reshape(1, -1).astype(jnp.float32),
        w2=w2.astype(jnp.float32),
        b2=b2.reshape(1, -1).astype(jnp.float32),
        w3p=w3p,
        b3p=b3p,
    )


def fcnet_forward(x, prepared: FCNetParams, *, tile_b=DEFAULT_TB, use_bf16=None,
                  out_dtype=jnp.float32):
    """x: any shape flattening to (-1, 784), like torch's x.view(-1, 784).

    use_bf16=None (default): bf16 x/W1 path is used iff x already arrives as bf16
      (the cast is then free at the producer).  use_bf16=True on an f32 x works but the
      wrapper-side cast is its own HBM pass over x -- only force it if that is acceptable.
    out_dtype: jnp.float32 (exact-ish) or jnp.bfloat16 (halves output write bytes)."""
    x2d = x.reshape(-1, IN_FEATURES)
    B = x2d.shape[0]

    if use_bf16 is None:
        use_bf16 = (x2d.dtype == jnp.bfloat16)
    if use_bf16:
        if x2d.dtype != jnp.bfloat16:
            # NOTE: extra HBM pass (read f32 + write bf16) -- see docstring.
            x2d = x2d.astype(jnp.bfloat16)
        w1 = prepared.w1_bf16
    else:
        if x2d.dtype != jnp.float32:
            x2d = x2d.astype(jnp.float32)
        w1 = prepared.w1

    tb = _choose_tile_b(B, int(tile_b))
    grid = (pl.cdiv(B, tb),)     # ragged last block handled by Pallas masking -- no jnp.pad

    const2d = lambda shape: pl.BlockSpec(shape, lambda i: (0, 0))

    out = pl.pallas_call(
        fcnet_kernel,
        out_shape=jax.ShapeDtypeStruct((B, OUT_PAD), out_dtype),
        grid=grid,
        in_specs=[
            pl.BlockSpec((tb, IN_FEATURES), lambda i: (i, 0)),  # x: tiled over batch
            const2d(w1.shape),        # weights/biases resident in VMEM across grid steps
            const2d(prepared.b1.shape),
            const2d(prepared.w2.shape),
            const2d(prepared.b2.shape),
            const2d(prepared.w3p.shape),
            const2d(prepared.b3p.shape),
        ],
        out_specs=pl.BlockSpec((tb, OUT_PAD), lambda i: (i, 0)),
        compiler_params=pltpu.CompilerParams(
            dimension_semantics=("parallel",),  # megacore sharding of batch tiles on v7x
            vmem_limit_bytes=_vmem_limit_bytes(
                tb, np.dtype(x2d.dtype).itemsize, np.dtype(out_dtype).itemsize),
        ),
    )(x2d, w1, prepared.b1, prepared.w2, prepared.b2, prepared.w3p, prepared.b3p)

    return out[:, :NUM_CLASSES]


def init_params(key, num_neurons=NUM_NEURONS):
    """nn.Linear-style init (uniform +/- 1/sqrt(fan_in)).
    Weights stored as (in_features, out_features); biases as (1, out_features)."""
    def linear(k, fan_in, fan_out):
        kw, kb = jax.random.split(k)
        bound = 1.0 / np.sqrt(fan_in)
        w = jax.random.uniform(kw, (fan_in, fan_out), jnp.float32, -bound, bound)
        b = jax.random.uniform(kb, (1, fan_out), jnp.float32, -bound, bound)
        return w, b

    k1, k2, k3 = jax.random.split(key, 3)
    w1, b1 = linear(k1, IN_FEATURES, HIDDEN)
    w2, b2 = linear(k2, HIDDEN, num_neurons)
    w3, b3 = linear(k3, num_neurons, NUM_CLASSES)
    return (w1, b1, w2, b2, w3, b3)


def _reference(x, params):
    w1, b1, w2, b2, w3, b3 = params
    h = jnp.maximum(x.reshape(-1, IN_FEATURES) @ w1 + b1, 0.0)
    h = jnp.maximum(h @ w2 + b2, 0.0)
    logits = h @ w3 + b3
    return jax.nn.softmax(logits, axis=1)


if __name__ == "__main__":
    key = jax.random.PRNGKey(0)
    kp, kx1, kx2, kx3 = jax.random.split(key, 4)

    params = init_params(kp)
    prepared = prepare_params(params)   # hoisted one-time weight packing

    # 1) Small MNIST-like input: batch=2, 1x28x28 (flattens to 784), f32 end to end.
    x_small = jax.random.normal(kx1, (2, 1, 28, 28), dtype=jnp.float32)
    out = jax.block_until_ready(fcnet_forward(x_small, prepared))
    ref = _reference(x_small, params)
    np.testing.assert_allclose(np.asarray(out), np.asarray(ref), rtol=1e-3, atol=1e-3)
    assert out.shape == (2, NUM_CLASSES)
    np.testing.assert_allclose(np.asarray(out).sum(axis=1), np.ones(2), rtol=1e-3, atol=1e-3)

    # 2) Ragged batch (100 % 64 != 0) with an explicit small tile: exercises the cdiv grid
    #    with a masked last block -- no wrapper-side jnp.pad / no extra HBM pass over x.
    x_big = jax.random.normal(kx2, (100, 784), dtype=jnp.float32)
    ref_big = _reference(x_big, params)
    out_big = jax.block_until_ready(fcnet_forward(x_big, prepared, tile_b=64))
    np.testing.assert_allclose(np.asarray(out_big), np.asarray(ref_big), rtol=1e-3, atol=1e-3)
    assert out_big.shape == (100, NUM_CLASSES)

    # 3) Larger batch exercising the auto tile chooser (>=4 grid steps at the default cap).
    x_multi = jax.random.normal(kx3, (2304, 784), dtype=jnp.float32)
    out_multi = jax.block_until_ready(fcnet_forward(x_multi, prepared))
    ref_multi = _reference(x_multi, params)
    np.testing.assert_allclose(np.asarray(out_multi), np.asarray(ref_multi),
                               rtol=1e-3, atol=1e-3)

    # 4) bf16 fast path: x already bf16 (as if produced upstream) -> auto-selected,
    #    halves the dominant HBM read (looser tolerance: input rounding).
    out_bf16 = jax.block_until_ready(fcnet_forward(x_big.astype(jnp.bfloat16), prepared))
    np.testing.assert_allclose(np.asarray(out_bf16), np.asarray(ref_big), rtol=3e-2, atol=3e-2)

    # 5) bf16 output store: keeps the unmasked 128-lane store, halves output write bytes.
    out_obf = jax.block_until_ready(fcnet_forward(x_big, prepared, out_dtype=jnp.bfloat16))
    np.testing.assert_allclose(np.asarray(out_obf.astype(jnp.float32)), np.asarray(ref_big),
                               rtol=2e-2, atol=5e-3)

    print("KERNEL_OK")
</pallas_src>

<mosaic_0001>
module attributes {stable_mosaic.version = 11 : i64} {
  func.func @fcnet_kernel(%arg0: i32, %arg1: memref<2x784xf32, #tpu.memory_space<vmem>>, %arg2: memref<784x20xf32, #tpu.memory_space<vmem>>, %arg3: memref<1x20xf32, #tpu.memory_space<vmem>>, %arg4: memref<20x5xf32, #tpu.memory_space<vmem>>, %arg5: memref<1x5xf32, #tpu.memory_space<vmem>>, %arg6: memref<5x128xf32, #tpu.memory_space<vmem>>, %arg7: memref<1x128xf32, #tpu.memory_space<vmem>>, %arg8: memref<2x128xf32, #tpu.memory_space<vmem>>) attributes {dimension_semantics = [#tpu.dimension_semantics<parallel>], iteration_bounds = array<i64: 1>, scalar_prefetch = 0 : i64, scratch_operands = 0 : i64, tpu.core_type = #tpu.core_type<tc>, window_params = [{transform_indices = @transform_0, window_bounds = array<i64: 2, 784>}, {pipeline_mode = #tpu.pipeline_mode<synchronous>, transform_indices = @transform_1, window_bounds = array<i64: 784, 20>}, {pipeline_mode = #tpu.pipeline_mode<synchronous>, transform_indices = @transform_2, window_bounds = array<i64: 1, 20>}, {pipeline_mode = #tpu.pipeline_mode<synchronous>, transform_indices = @transform_3, window_bounds = array<i64: 20, 5>}, {pipeline_mode = #tpu.pipeline_mode<synchronous>, transform_indices = @transform_4, window_bounds = array<i64: 1, 5>}, {pipeline_mode = #tpu.pipeline_mode<synchronous>, transform_indices = @transform_5, window_bounds = array<i64: 5, 128>}, {pipeline_mode = #tpu.pipeline_mode<synchronous>, transform_indices = @transform_6, window_bounds = array<i64: 1, 128>}, {transform_indices = @transform_7, window_bounds = array<i64: 2, 128>}]} {
    %c0 = arith.constant 0 : index
    %c0_0 = arith.constant 0 : index
    %0 = vector.load %arg1[%c0, %c0_0] : memref<2x784xf32, #tpu.memory_space<vmem>>, vector<2x784xf32>
    %c0_1 = arith.constant 0 : index
    %c0_2 = arith.constant 0 : index
    %1 = vector.load %arg2[%c0_1, %c0_2] : memref<784x20xf32, #tpu.memory_space<vmem>>, vector<784x20xf32>
    %cst = arith.constant dense<0.000000e+00> : vector<2x20xf32>
    %2 = tpu.matmul %0, %1, %cst {dimension_numbers = #tpu.dot_dimension_numbers<[1], [0], [0], [1], [0, 0, 1, 1], [], []>} : vector<2x784xf32>, vector<784x20xf32>, vector<2x20xf32> -> vector<2x20xf32>
    %c0_3 = arith.constant 0 : index
    %c0_4 = arith.constant 0 : index
    %3 = vector.load %arg3[%c0_3, %c0_4] : memref<1x20xf32, #tpu.memory_space<vmem>>, vector<1x20xf32>
    %4 = vector.broadcast %3 : vector<1x20xf32> to vector<2x20xf32>
    %5 = arith.addf %2, %4 : vector<2x20xf32>
    %cst_5 = arith.constant 0.000000e+00 : f32
    %6 = vector.broadcast %cst_5 : f32 to vector<2x20xf32>
    %7 = arith.maximumf %5, %6 : vector<2x20xf32>
    %c0_6 = arith.constant 0 : index
    %c0_7 = arith.constant 0 : index
    %8 = vector.load %arg4[%c0_6, %c0_7] : memref<20x5xf32, #tpu.memory_space<vmem>>, vector<20x5xf32>
    %cst_8 = arith.constant dense<0.000000e+00> : vector<2x5xf32>
    %9 = tpu.matmul %7, %8, %cst_8 {dimension_numbers = #tpu.dot_dimension_numbers<[1], [0], [0], [1], [0, 0, 1, 1], [], []>} : vector<2x20xf32>, vector<20x5xf32>, vector<2x5xf32> -> vector<2x5xf32>
    %c0_9 = arith.constant 0 : index
    %c0_10 = arith.constant 0 : index
    %10 = vector.load %arg5[%c0_9, %c0_10] : memref<1x5xf32, #tpu.memory_space<vmem>>, vector<1x5xf32>
    %11 = vector.broadcast %10 : vector<1x5xf32> to vector<2x5xf32>
    %12 = arith.addf %9, %11 : vector<2x5xf32>
    %cst_11 = arith.constant 0.000000e+00 : f32
    %13 = vector.broadcast %cst_11 : f32 to vector<2x5xf32>
    %14 = arith.maximumf %12, %13 : vector<2x5xf32>
    %c0_12 = arith.constant 0 : index
    %c0_13 = arith.constant 0 : index
    %15 = vector.load %arg6[%c0_12, %c0_13] : memref<5x128xf32, #tpu.memory_space<vmem>>, vector<5x128xf32>
    %cst_14 = arith.constant dense<0.000000e+00> : vector<2x128xf32>
    %16 = tpu.matmul %14, %15, %cst_14 {dimension_numbers = #tpu.dot_dimension_numbers<[1], [0], [0], [1], [0, 0, 1, 1], [], []>} : vector<2x5xf32>, vector<5x128xf32>, vector<2x128xf32> -> vector<2x128xf32>
    %c0_15 = arith.constant 0 : index
    %c0_16 = arith.constant 0 : index
    %17 = vector.load %arg7[%c0_15, %c0_16] : memref<1x128xf32, #tpu.memory_space<vmem>>, vector<1x128xf32>
    %18 = vector.broadcast %17 : vector<1x128xf32> to vector<2x128xf32>
    %19 = arith.addf %16, %18 : vector<2x128xf32>
    %cst_17 = arith.constant dense<0xFF800000> : vector<2xf32>
    %20 = vector.multi_reduction <maximumf>, %19, %cst_17 [1] : vector<2x128xf32> to vector<2xf32>
    %21 = vector.shape_cast %20 : vector<2xf32> to vector<2x1xf32>
    %22 = vector.broadcast %21 : vector<2x1xf32> to vector<2x128xf32>
    %23 = arith.subf %19, %22 : vector<2x128xf32>
    %24 = math.exp %23 : vector<2x128xf32>
    %cst_18 = arith.constant dense<0.000000e+00> : vector<2xf32>
    %25 = vector.multi_reduction <add>, %24, %cst_18 [1] : vector<2x128xf32> to vector<2xf32>
    %26 = vector.shape_cast %25 : vector<2xf32> to vector<2x1xf32>
    %27 = tpu.reciprocal %26 {approx = true} : vector<2x1xf32> -> vector<2x1xf32>
    %28 = vector.broadcast %27 : vector<2x1xf32> to vector<2x128xf32>
    %29 = arith.mulf %24, %28 : vector<2x128xf32>
    %c0_19 = arith.constant 0 : index
    %c0_20 = arith.constant 0 : index
    %30 = vector.load %arg8[%c0_19, %c0_20] : memref<2x128xf32, #tpu.memory_space<vmem>>, vector<2x128xf32>
    tpu.vector_store %arg8[%c0_19, %c0_20], %29 {strides = array<i32>} : memref<2x128xf32, #tpu.memory_space<vmem>>, vector<2x128xf32>,
    return
  }
  func.func @transform_0(%arg0: i32) -> (i32, i32) {
    %c0_i32 = arith.constant 0 : i32
    %c0_i32_0 = arith.constant 0 : i32
    return %arg0, %c0_i32 : i32, i32
  }
  func.func @transform_1(%arg0: i32) -> (i32, i32) {
    %c0_i32 = arith.constant 0 : i32
    %c0_i32_0 = arith.constant 0 : i32
    %c0_i32_1 = arith.constant 0 : i32
    return %c0_i32, %c0_i32_0 : i32, i32
  }
  func.func @transform_2(%arg0: i32) -> (i32, i32) {
    %c0_i32 = arith.constant 0 : i32
    %c0_i32_0 = arith.constant 0 : i32
    %c0_i32_1 = arith.constant 0 : i32
    return %c0_i32, %c0_i32_0 : i32, i32
  }
  func.func @transform_3(%arg0: i32) -> (i32, i32) {
    %c0_i32 = arith.constant 0 : i32
    %c0_i32_0 = arith.constant 0 : i32
    %c0_i32_1 = arith.constant 0 : i32
    return %c0_i32, %c0_i32_0 : i32, i32
  }
  func.func @transform_4(%arg0: i32) -> (i32, i32) {
    %c0_i32 = arith.constant 0 : i32
    %c0_i32_0 = arith.constant 0 : i32
    %c0_i32_1 = arith.constant 0 : i32
    return %c0_i32, %c0_i32_0 : i32, i32
  }
  func.func @transform_5(%arg0: i32) -> (i32, i32) {
    %c0_i32 = arith.constant 0 : i32
    %c0_i32_0 = arith.constant 0 : i32
    %c0_i32_1 = arith.constant 0 : i32
    return %c0_i32, %c0_i32_0 : i32, i32
  }
  func.func @transform_6(%arg0: i32) -> (i32, i32) {
    %c0_i32 = arith.constant 0 : i32
    %c0_i32_0 = arith.constant 0 : i32
    %c0_i32_1 = arith.constant 0 : i32
    return %c0_i32, %c0_i32_0 : i32, i32
  }
  func.func @transform_7(%arg0: i32) -> (i32, i32) {
    %c0_i32 = arith.constant 0 : i32
    %c0_i32_0 = arith.constant 0 : i32
    return %arg0, %c0_i32 : i32, i32
  }
}

</mosaic_0001>

<bundles_post_ra>
// kernel: tpu_custom_call.1
= control target key start
LH: loop header
LB: loop body
LE: loop exit
PB: predicated region body
PF: predicated region fallthrough
CT: control target
= control target key end

     0   :  { %v836_v27 = vmov 1983009808   ;;  %v140_v29 = vlaneseq  ;;  %s1227_s0 = inlined_call_operand.vmem [shape: f32[2,784], index: 0, kind: input, shape index: {}]   ;;  %s1228_s1 = inlined_call_operand.vmem [shape: f32[784,20], index: 1, kind: input, shape index: {}]   ;;  %s1229_s2 = inlined_call_operand.vmem [shape: f32[1,20], index: 2, kind: input, shape index: {}]   ;;  %s1230_s3 = inlined_call_operand.vmem [shape: f32[20,5], index: 3, kind: input, shape index: {}]   ;;  %s1231_s4 = inlined_call_operand.vmem [shape: f32[1,5], index: 4, kind: input, shape index: {}]   ;;  %s1232_s5 = inlined_call_operand.vmem [shape: f32[5,128], index: 5, kind: input, shape index: {}]   ;;  %s1233_s6 = inlined_call_operand.vmem [shape: f32[1,128], index: 6, kind: input, shape index: {}]   ;;  %s1234_s7 = inlined_call_operand.hbm [shape: f32[2,128], index: 7, kind: output, shape index: {}]  }
   0x1   :  { %v60_v0 = vld [vmem:[%s1228_s1 + $0xf8] sm:$0xff]  ;;  %v59_v2 = vld [vmem:[%s1228_s1 + $0xf0] sm:$0xff]  ;;  %v58_v6 = vld [vmem:[%s1228_s1 + $0xe8] sm:$0xff]  ;;  %v138_v28 = vunpack.c.l.s4 %v836_v27 }
   0x2   :  { %v44_v1 = vld [vmem:[%s1228_s1 + $0x78] sm:$0xff]  ;;  %669 = vmatprep.subr.mxu0 %v60_v0  ;;  %v43_v4 = vld [vmem:[%s1228_s1 + $0x70] sm:$0xff]  ;;  %v42_v8 = vld [vmem:[%s1228_s1 + $0x68] sm:$0xff]  ;;  %v141_v39 = vshrl.u32 %v140_v29, 7 }
   0x3   :  { %v92_v3 = vld [vmem:[%s1228_s1 + $0x1f8] sm:$0xff]  ;;  %670 = vmatpush3.msra.mxu0 %v44_v1  ;;  %v91_v7 = vld [vmem:[%s1228_s1 + $0x1f0] sm:$0xff]  ;;  %v90_v10 = vld [vmem:[%s1228_s1 + $0x1e8] sm:$0xff]  ;;  %v139_v38 = vunpack.c.0.s8 %v138_v28 }
   0x4   :  { %v76_v5 = vld [vmem:[%s1228_s1 + $0x178] sm:$0xff]  ;;  %704 = vmatprep.subr.mxu1 %v92_v3  ;;  %671 = vmatprep.subr.mxu0 %v59_v2  ;;  %v75_v9 = vld [vmem:[%s1228_s1 + $0x170] sm:$0xff]  ;;  %v57_v11 = vld [vmem:[%s1228_s1 + $0xe0] sm:$0xff] }
   0x5   :  { %705 = vmatpush3.msra.mxu1 %v76_v5  ;;  %672 = vmatpush3.msra.mxu0 %v43_v4  ;;  %v74_v12 = vld [vmem:[%s1228_s1 + $0x168] sm:$0xff]  ;;  %v41_v13 = vld [vmem:[%s1228_s1 + $0x60] sm:$0xff]  ;;  %v56_v15 = vld [vmem:[%s1228_s1 + $0xd8] sm:$0xff]  ;;  %v1009_v48 = vsub.s32 %v139_v38, %v141_v39 }
   0x6   :  { %706 = vmatprep.subr.mxu1 %v91_v7  ;;  %673 = vmatprep.subr.mxu0 %v58_v6  ;;  %v89_v14 = vld [vmem:[%s1228_s1 + $0x1e0] sm:$0xff]  ;;  %v40_v17 = vld [vmem:[%s1228_s1 + $0x58] sm:$0xff]  ;;  %v55_v19 = vld [vmem:[%s1228_s1 + $0xd0] sm:$0xff] }
   0x7   :  { %707 = vmatpush3.msra.mxu1 %v75_v9  ;;  %674 = vmatpush3.msra.mxu0 %v42_v8  ;;  %v73_v16 = vld [vmem:[%s1228_s1 + $0x160] sm:$0xff]  ;;  %v88_v18 = vld [vmem:[%s1228_s1 + $0x1d8] sm:$0xff]  ;;  %v39_v21 = vld [vmem:[%s1228_s1 + $0x50] sm:$0xff] }
   0x8   :  { %708 = vmatprep.subr.mxu1 %v90_v10  ;;  %675 = vmatprep.subr.mxu0 %v57_v11  ;;  %v72_v20 = vld [vmem:[%s1228_s1 + $0x158] sm:$0xff]  ;;  %v87_v22 = vld [vmem:[%s1228_s1 + $0x1d0] sm:$0xff]  ;;  %v54_v23 = vld [vmem:[%s1228_s1 + $0xc8] sm:$0xff] }
   0x9   :  { %709 = vmatpush3.msra.mxu1 %v74_v12  ;;  %676 = vmatpush3.msra.mxu0 %v41_v13  ;;  %v71_v24 = vld [vmem:[%s1228_s1 + $0x150] sm:$0xff]  ;;  %v38_v25 = vld [vmem:[%s1228_s1 + $0x48] sm:$0xff]  ;;  %v53_v30 = vld [vmem:[%s1228_s1 + $0xc0] sm:$0xff] }
   0xa   :  { %710 = vmatprep.subr.mxu1 %v89_v14  ;;  %677 = vmatprep.subr.mxu0 %v56_v15  ;;  %v86_v26 = vld [vmem:[%s1228_s1 + $0x1c8] sm:$0xff]  ;;  %v37_v32 = vld [vmem:[%s1228_s1 + $0x40] sm:$0xff]  ;;  %v52_v34 = vld [vmem:[%s1228_s1 + $0xb8] sm:$0xff] }
   0xb   :  { %711 = vmatpush3.msra.mxu1 %v73_v16  ;;  %678 = vmatpush3.msra.mxu0 %v40_v17  ;;  %v70_v31 = vld [vmem:[%s1228_s1 + $0x148] sm:$0xff]  ;;  %v85_v33 = vld [vmem:[%s1228_s1 + $0x1c0] sm:$0xff]  ;;  %v36_v36 = vld [vmem:[%s1228_s1 + $0x38] sm:$0xff] }
   0xc   :  { %712 = vmatprep.subr.mxu1 %v88_v18  ;;  %679 = vmatprep.subr.mxu0 %v55_v19  ;;  %v69_v35 = vld [vmem:[%s1228_s1 + $0x140] sm:$0xff]  ;;  %v84_v37 = vld [vmem:[%s1228_s1 + $0x1b8] sm:$0xff]  ;;  %v51_v40 = vld [vmem:[%s1228_s1 + $0xb0] sm:$0xff] }
   0xd   :  { %713 = vmatpush3.msra.mxu1 %v72_v20  ;;  %680 = vmatpush3.msra.mxu0 %v39_v21  ;;  %v68_v41 = vld [vmem:[%s1228_s1 + $0x138] sm:$0xff]  ;;  %v35_v42 = vld [vmem:[%s1228_s1 + $0x30] sm:$0xff]  ;;  %v50_v44 = vld [vmem:[%s1228_s1 + $0xa8] sm:$0xff] }
   0xe   :  { %714 = vmatprep.subr.mxu1 %v87_v22  ;;  %681 = vmatprep.subr.mxu0 %v54_v23  ;;  %v83_v43 = vld [vmem:[%s1228_s1 + $0x1b0] sm:$0xff]  ;;  %v34_v46 = vld [vmem:[%s1228_s1 + $0x28] sm:$0xff]  ;;  %v49_v49 = vld [vmem:[%s1228_s1 + $0xa0] sm:$0xff] }
   0xf   :  { %715 = vmatpush3.msra.mxu1 %v71_v24  ;;  %682 = vmatpush3.msra.mxu0 %v38_v25  ;;  %v67_v45 = vld [vmem:[%s1228_s1 + $0x130] sm:$0xff]  ;;  %v82_v47 = vld [vmem:[%s1228_s1 + $0x1a8] sm:$0xff]  ;;  %v27_v51 = vld [vmem:[%s1227_s0] sm:$0xff] }
  0x10   :  { %716 = vmatprep.subr.mxu1 %v86_v26  ;;  %683 = vmatprep.subr.mxu0 %v53_v30  ;;  %v66_v50 = vld [vmem:[%s1228_s1 + $0x128] sm:$0xff]  ;;  %v33_v52 = vld [vmem:[%s1228_s1 + $0x20] sm:$0xff]  ;;  %v48_v54 = vld [vmem:[%s1228_s1 + $0x98] sm:$0xff]  ;;  %v143_v58 = vrot.slane %v27_v51, %v1009_v48  ;;  %v136_v59 = vcombine.high %v27_v51, %v27_v51 }
  0x11   :  { %717 = vmatpush3.msra.mxu1 %v70_v31  ;;  %684 = vmatpush3.msra.mxu0 %v37_v32  ;;  %v81_v53 = vld [vmem:[%s1228_s1 + $0x1a0] sm:$0xff]  ;;  %v32_v56 = vld [vmem:[%s1228_s1 + $0x18] sm:$0xff]  ;;  %v47_v60 = vld [vmem:[%s1228_s1 + $0x90] sm:$0xff] }
  0x12   :  { %718 = vmatprep.subr.mxu1 %v85_v33  ;;  %685 = vmatprep.subr.mxu0 %v52_v34  ;;  %v65_v55 = vld [vmem:[%s1228_s1 + $0x120] sm:$0xff]  ;;  %v80_v57 = vld [vmem:[%s1228_s1 + $0x198] sm:$0xff]  ;;  %v31_v62 = vld [vmem:[%s1228_s1 + $0x10] sm:$0xff]  ;;  %v151_v4 = vcombine.high %v143_v58, %v143_v58  ;;  %v150_v5 = vrot.slane %v136_v59, %v1009_v48 }
  0x13   :  { %719 = vmatpush3.msra.mxu1 %v69_v35  ;;  %686 = vmatpush3.msra.mxu0 %v36_v36  ;;  %v64_v61 = vld [vmem:[%s1228_s1 + $0x118] sm:$0xff]  ;;  %v79_v63 = vld [vmem:[%s1228_s1 + $0x190] sm:$0xff]  ;;  %v46_v0 = vld [vmem:[%s1228_s1 + $0x88] sm:$0xff] }
  0x14   :  { %720 = vmatprep.subr.mxu1 %v84_v37  ;;  %687 = vmatprep.subr.mxu0 %v51_v40  ;;  %v63_v1 = vld [vmem:[%s1228_s1 + $0x110] sm:$0xff]  ;;  %v30_v2 = vld [vmem:[%s1228_s1 + $0x8] sm:$0xff]  ;;  %v45_v6 = vld [vmem:[%s1228_s1 + $0x80] sm:$0xff]  ;;  %v152_v12 = vcombine.high %v150_v5, %v150_v5 }
  0x15   :  { %721 = vmatpush3.msra.mxu1 %v68_v41  ;;  %688 = vmatpush3.msra.mxu0 %v35_v42  ;;  %v78_v3 = vld [vmem:[%s1228_s1 + $0x188] sm:$0xff]  ;;  %v29_v7 = vld [vmem:[%s1228_s1] sm:$0xff]  ;;  %v124_v10 = vld [vmem:[%s1228_s1 + $0x2f8] sm:$0xff] }
  0x16   :  { %722 = vmatprep.subr.mxu1 %v83_v43  ;;  %689 = vmatprep.subr.mxu0 %v50_v44  ;;  %v62_v8 = vld [vmem:[%s1228_s1 + $0x108] sm:$0xff]  ;;  %v77_v9 = vld [vmem:[%s1228_s1 + $0x180] sm:$0xff]  ;;  %v108_v13 = vld [vmem:[%s1228_s1 + $0x278] sm:$0xff] }
  0x17   :  { %723 = vmatpush3.msra.mxu1 %v67_v45  ;;  %690 = vmatpush3.msra.mxu0 %v34_v46  ;;  %v61_v11 = vld [vmem:[%s1228_s1 + $0x100] sm:$0xff]  ;;  %v28_v14 = vld [vmem:[%s1227_s0 + $0x8] sm:$0x3f]  ;;  %v123_v15 = vld [vmem:[%s1228_s1 + $0x2f0] sm:$0xff] }
  0x18   :  { %724 = vmatprep.subr.mxu1 %v82_v47  ;;  %691 = vmatprep.subr.mxu0 %v49_v49  ;;  %v1092_v16 = vrot.slane %v28_v14, %v1009_v48 }
  0x19   :  { %725 = vmatpush3.msra.mxu1 %v66_v50  ;;  %692 = vmatpush3.msra.mxu0 %v33_v52 }
  0x1a   :  { %726 = vmatprep.subr.mxu1 %v81_v53  ;;  %693 = vmatprep.subr.mxu0 %v48_v54 }
  0x1b   :  { %727 = vmatpush3.msra.mxu1 %v65_v55  ;;  %694 = vmatpush3.msra.mxu0 %v32_v56 }
  0x1c   :  { %728 = vmatprep.subr.mxu1 %v80_v57  ;;  %695 = vmatprep.subr.mxu0 %v47_v60 }
  0x1d   :  { %729 = vmatpush3.msra.mxu1 %v64_v61  ;;  %696 = vmatpush3.msra.mxu0 %v31_v62 }
  0x1e   :  { %730 = vmatprep.subr.mxu1 %v79_v63  ;;  %697 = vmatprep.subr.mxu0 %v46_v0 }
  0x1f   :  { %731 = vmatpush3.msra.mxu1 %v63_v1  ;;  %698 = vmatpush3.msra.mxu0 %v30_v2 }
  0x20   :  { %732 = vmatprep.subr.mxu1 %v78_v3  ;;  %699 = vmatprep.subr.mxu0 %v45_v6 }
  0x21   :  { %242 = vmatprep.mubr.f32.mxu0 %v151_v4  ;;  %700 = vmatpush3.msra.mxu0 %v29_v7 }
  0x22   :  { %733 = vmatpush3.msra.mxu1 %v62_v8  ;;  %243 = vmatmul.mubr.f32.vlgmr.msra.gmra.mxu0 %v143_v58 }
  0x23   :  { %734 = vmatprep.subr.mxu1 %v77_v9 }
  0x24   :  { %12 = vsyncpa [#allocation3], 0  ;;  %739 = vmatprep.subr.mxu0 %v124_v10  ;;  %735 = vmatpush3.msra.mxu1 %v61_v11  ;;  %v107_v17 = vld [vmem:[%s1228_s1 + $0x270] sm:$0xff]  ;;  %v122_v18 = vld [vmem:[%s1228_s1 + $0x2e8] sm:$0xff]  ;;  %v153_v19 = vcombine.high %v28_v14, %v28_v14  ;;  %v168_v20 = vcombine.high %v1092_v16, %v1092_v16  ;;  %v837_v25 = vmov 0.0   ;;  %vm175_vm0 = vcmask 130048  }
  0x25   :  { %312 = vmatprep.mubr.f32.mxu1 %v152_v12  ;;  %740 = vmatpush3.msra.mxu0 %v108_v13  ;;  %v106_v21 = vld [vmem:[%s1228_s1 + $0x268] sm:$0xff]  ;;  %v121_v23 = vld [vmem:[%s1228_s1 + $0x2e0] sm:$0xff]  ;;  %v120_v27 = vld [vmem:[%s1228_s1 + $0x2d8] sm:$0xff]  ;;  %vm838_vm1 = vmmov 0   ;;  %vm473_vm2 = vcmask 1043456   ;;  %vm469_vm3 = vcmask 162816  }
  0x26   :  { %313 = vmatmul.mubr.f32.vlgmr.msra.gmra.mxu1 %v150_v5  ;;  %741 = vmatprep.subr.mxu0 %v123_v15  ;;  %v126_v22 = vld [vmem:[%s1228_s1 + $0x308] sm:$0xff]  ;;  %v105_v24 = vld [vmem:[%s1228_s1 + $0x260] sm:$0xff]  ;;  %v167_v28 = vrot.slane %v153_v19, %v1009_v48  ;;  %v104_v29 = vld [vmem:[%s1228_s1 + $0x258] sm:$0xff]  ;;  %vm560_vm4 = vcmask 1044480   ;;  %vm556_vm5 = vcmask 39936   ;;  %vm634_vm6 = vcmask 1041408  }
  0x27   :  { %742 = vmatpush3.msra.mxu0 %v107_v17  ;;  %382 = vmatprep.mubr.f32.mxu0 %v168_v20  ;;  %v125_v26 = vld [vmem:[%s1228_s1 + $0x300] sm:$0xff]  ;;  %v119_v30 = vld [vmem:[%s1228_s1 + $0x2d0] sm:$0xff]  ;;  %v118_v32 = vld [vmem:[%s1228_s1 + $0x2c8] sm:$0xff] }
  0x28   :  { %743 = vmatprep.subr.mxu0 %v122_v18  ;;  %783 = vmatprep.subr.mxu1 %v837_v25  ;;  %v103_v31 = vld [vmem:[%s1228_s1 + $0x250] sm:$0xff]  ;;  %v102_v33 = vld [vmem:[%s1228_s1 + $0x248] sm:$0xff]  ;;  %v117_v34 = vld [vmem:[%s1228_s1 + $0x2c0] sm:$0xff] }
  0x29   :  { %744 = vmatpush3.msra.mxu0 %v106_v21  ;;  %784 = vmatpush3.msra.mxu1 %v126_v22  ;;  %v101_v35 = vld [vmem:[%s1228_s1 + $0x240] sm:$0xff]  ;;  %v116_v36 = vld [vmem:[%s1228_s1 + $0x2b8] sm:$0xff]  ;;  %v115_v38 = vld [vmem:[%s1228_s1 + $0x2b0] sm:$0xff] }
  0x2a   :  { %745 = vmatprep.subr.mxu0 %v121_v23  ;;  %785 = vmatprep.subr.mxu1 %v837_v25  ;;  %v100_v37 = vld [vmem:[%s1228_s1 + $0x238] sm:$0xff]  ;;  %v99_v39 = vld [vmem:[%s1228_s1 + $0x230] sm:$0xff]  ;;  %v114_v40 = vld [vmem:[%s1228_s1 + $0x2a8] sm:$0xff] }
  0x2b   :  { %746 = vmatpush3.msra.mxu0 %v105_v24  ;;  %786 = vmatpush3.msra.mxu1 %v125_v26  ;;  %v98_v41 = vld [vmem:[%s1228_s1 + $0x228] sm:$0xff]  ;;  %v113_v42 = vld [vmem:[%s1228_s1 + $0x2a0] sm:$0xff]  ;;  %v112_v44 = vld [vmem:[%s1228_s1 + $0x298] sm:$0xff] }
  0x2c   :  { %747 = vmatprep.subr.mxu0 %v120_v27  ;;  %787 = vmatprep.mubr.msk.f32.mxu1 %vm838_vm1, %v837_v25  ;;  %v97_v43 = vld [vmem:[%s1228_s1 + $0x220] sm:$0xff]  ;;  %v96_v45 = vld [vmem:[%s1228_s1 + $0x218] sm:$0xff]  ;;  %v111_v46 = vld [vmem:[%s1228_s1 + $0x290] sm:$0xff] }
  0x2d   :  { %748 = vmatpush3.msra.mxu0 %v104_v29  ;;  %788 = vmatmul.mubr.msk.f32.vlgmr.msra.gmra.mxu1 %vm175_vm0, %v167_v28  ;;  %v95_v47 = vld [vmem:[%s1228_s1 + $0x210] sm:$0xff]  ;;  %v110_v48 = vld [vmem:[%s1228_s1 + $0x288] sm:$0xff]  ;;  %v109_v50 = vld [vmem:[%s1228_s1 + $0x280] sm:$0xff] }
  0x2e   :  { %749 = vmatprep.subr.mxu0 %v119_v30  ;;  %790 = vmatprep.subr.mxu1 %v837_v25  ;;  %v94_v49 = vld [vmem:[%s1228_s1 + $0x208] sm:$0xff]  ;;  %v93_v51 = vld [vmem:[%s1228_s1 + $0x200] sm:$0xff]  ;;  %v461_v52 = vld [vmem:[%s1230_s3 + $0x10] sm:$0xf] }
  0x2f   :  { %750 = vmatpush3.msra.mxu0 %v103_v31  ;;  %796 = vmatprep.mubr.msk.f32.mxu1 %vm838_vm1, %v837_v25  ;;  %v460_v53 = vld [vmem:[%s1230_s3 + $0x8] sm:$0xff]  ;;  %v459_v54 = vld [vmem:[%s1230_s3] sm:$0xff] }
  0x30   :  { %751 = vmatprep.subr.mxu0 %v118_v32  ;;  %791 = vmatpush3.msk.msra.mxu1 %vm473_vm2, %v461_v52  ;;  %v661_v62 = vld [vmem:[%s1229_s2] ss:$0 sm:$0xff] }
  0x31   :  { %752 = vmatpush3.msra.mxu0 %v102_v33  ;;  %792 = vmatprep.subr.mxu1 %v837_v25  ;;  %v548_v8 = vld [vmem:[%s1232_s5] sm:$0x1f] }
  0x32   :  { %753 = vmatprep.subr.mxu0 %v117_v34  ;;  %793 = vmatpush3.msra.mxu1 %v460_v53  ;;  %v663_v9 = vld [vmem:[%s1231_s4] ss:$0 sm:$0xff]  ;;  %s839_s4 = smov [#allocation2]  }
  0x33   :  { %754 = vmatpush3.msra.mxu0 %v101_v35  ;;  %794 = vmatprep.subr.mxu1 %v837_v25  ;;  %v666_v14 = vld [vmem:[%s1233_s6] ss:$0 sm:$0xff]  ;;  %s653_s5 = sshll.u32 %s839_s4, 4  ;;  %s654_s5 = int_to_ptr.vmem [resolvable:$true] %s653_s5 }
  0x34   :  { %755 = vmatprep.subr.mxu0 %v116_v36  ;;  %795 = vmatpush3.msra.mxu1 %v459_v54  ;;  %s814_s6 = scalar_lea.vmem %s654_s5, 32  ;;  %p819_p1 = scmp.lt.s32.totalorder %s654_s5, %s654_s5 }
  0x35   :  { %756 = vmatpush3.msra.mxu0 %v100_v37  ;;  %799 = vmatprep.subr.mxu1 %v837_v25  ;;  %p815_p0 = scmp.ne.s32.totalorder %s654_s5, %s814_s6  ;;  %p820_p2 = scmp.lt.s32.totalorder %s814_s6, %s814_s6 }
  0x36   :  { %757 = vmatprep.subr.mxu0 %v115_v38 }
  0x37   :  { %758 = vmatpush3.msra.mxu0 %v99_v39  ;;  %p821_p3 = por %p820_p2, %p819_p1 }
  0x38   :  { %759 = vmatprep.subr.mxu0 %v114_v40 }
  0x39   :  { %760 = vmatpush3.msra.mxu0 %v98_v41  ;;  %p822_p4 = pnand %p821_p3, %p815_p0 }
  0x3a   :  { %761 = vmatprep.subr.mxu0 %v113_v42 }
  0x3b   :  { %762 = vmatpush3.msra.mxu0 %v97_v43 }
  0x3c   :  { %763 = vmatprep.subr.mxu0 %v112_v44 }
  0x3d   :  { %764 = vmatpush3.msra.mxu0 %v96_v45 }
  0x3e   :  { %765 = vmatprep.subr.mxu0 %v111_v46 }
  0x3f   :  { %766 = vmatpush3.msra.mxu0 %v95_v47 }
  0x40   :  { %767 = vmatprep.subr.mxu0 %v110_v48 }
  0x41   :  { %768 = vmatpush3.msra.mxu0 %v94_v49 }
  0x42   :  { %769 = vmatprep.subr.mxu0 %v109_v50 }
  0x43   :  { %770 = vmatpush3.msra.mxu0 %v93_v51 }
  0x44   :  { %383 = vmatmul.mubr.f32.vlgmr.msra.gmra.mxu0 %v1092_v16 }
  0xe2   :  { %v701_v59 = vpop.f32.mrf.mxu0 }
  0xe4   :  { %v702_v60 = vpop.f32.mrf.mxu0 }
  0xe5   :  { %v703_v61 = vadd.f32 %v702_v60, %v701_v59 }
  0xe6   :  { %v736_v55 = vpop.f32.mrf.mxu1 }
  0xe7   :  { %v245_v63 = vadd.f32 %v703_v61, %v661_v62 }
  0xe8   :  { %v737_v56 = vpop.f32.mrf.mxu1 }
  0xe9   :  { %v738_v0 = vadd.f32 %v737_v56, %v736_v55 }
  0xeb   :  { %v315_v3 = vadd.f32 %v738_v0, %v245_v63 }
  0xed   :  { %v454_v57 = vpop.f32.mrf.mxu1 }
  0xef   :  { %v789_v58 = vpop.f32.mrf.mxu1 }
 0x104   :  { %v771_v1 = vpop.f32.mrf.mxu0 }
 0x106   :  { %v772_v2 = vpop.f32.mrf.mxu0 }
 0x107   :  { %v773_v4 = vadd.f32 %v772_v2, %v771_v1 }
 0x109   :  { %v385_v5 = vadd.f32 %v773_v4, %v315_v3 }
 0x10b   :  { %v455_v6 = vadd.f32 %v454_v57, %v385_v5 }
 0x10d   :  { %v458_v7 = vmax.f32 %v455_v6, 0.0 }
 0x10f   :  { %797 = vmatmul.mubr.msk.f32.vlgmr.msra.gmra.mxu1 %vm469_vm3, %v458_v7 }
 0x110   :  { %801 = vmatprep.mubr.msk.f32.mxu1 %vm838_vm1, %v837_v25  ;;  %800 = vmatpush3.msk.msra.mxu1 %vm560_vm4, %v548_v8 }
 0x1cf   :  { %v543_v10 = vpop.f32.mrf.mxu1 }
 0x1d0   :  { %v544_v11 = vadd.f32 %v663_v9, %v543_v10 }
 0x1d1   :  { %v798_v12 = vpop.f32.mrf.mxu1 }
 0x1d2   :  { %v547_v13 = vmax.f32 %v544_v11, 0.0 }
 0x1d4   :  { %802 = vmatmul.mubr.msk.f32.vlgmr.msra.gmra.mxu1 %vm556_vm5, %v547_v13 }
 0x294   :  { %v630_v15 = vpop.f32.mrf.mxu1 }
 0x295   :  { %v631_v16 = vadd.f32 %v666_v14, %v630_v15 }
 0x296   :  { %v803_v17 = vpop.f32.mrf.mxu1 }
 0x297   :  { %v635_v18 = vsel %vm634_vm6, %v631_v16, -inf }
 0x298   :  { %636 = vmax.xlane.f32.xlu0 %v635_v18 }
 0x321   :  { %v637_v19 = vpop.xlane.xlu0 %636 }
 0x322   :  { %v638_v20 = vsub.f32 %v631_v16, %v637_v19 }
 0x324   :  { %v639_v21 = vmul.f32 1.442695, %v638_v20 }
 0x326   :  { %810 = vpow2.f32 %v639_v21 }
 0x333   :  { %v811_v22 = vpop.eup %810 }
 0x334   :  { %v641_v23 = vsel %vm634_vm6, %v811_v22, 0.0 }
 0x335   :  { %642 = vadd.xlane.f32.xlu0 %v641_v23 }
 0x3be   :  { %v643_v24 = vpop.xlane.xlu0 %642 }
 0x3bf   :  { %812 = vrcp.f32 %v643_v24 }
 0x3cc   :  { %v813_v25 = vpop.eup %812 }
 0x3cd   :  { %v645_v26 = vmul.f32 %v813_v25, %v811_v22 }
 0x3cf   :  { %646 = vst [vmem:[#allocation2] sm:$0x3] %v645_v26 }
 0x3d0   :  { %825 = shalt.err (!%p822_p4)
}
 0x3d1   :  { %656 = dma.vmem_to_hbm [thread:$0]  %s654_s5, 32, %s1234_s7, [#allocation3]  }
 0x3d2   :  { %834 = dma.done.wait [#allocation3], 32  }
 0x3d3   :  { %835 = vsyncadd [#allocation3], 4294967264 }
 0x3d4   :  { %660 = vsyncpa [#allocation3], 1 }

</bundles_post_ra>
